<compile_context>
chip_gen: v7x
topology: tpu7x:2x2x1
jax: 0.10.0
libtpu: 0.0.40
codegen_flags: <defaults>
</compile_context>

<pallas_src>
import numpy as np
import jax
import jax.numpy as jnp
from jax.experimental import pallas as pl
from jax.experimental.pallas import tpu as pltpu


_LANE = 128
_SUBLANE = 8
_VMEM_BUDGET = 40 * 1024 * 1024   # working-set budget (v7x has 64 MiB physical VMEM)
_VMEM_LIMIT = 48 * 1024 * 1024


def _round_up(n, m):
    return ((n + m - 1) // m) * m


# ----------------------------- kernels ------------------------------------- #

def _noisy_train_kernel(x_ref, wmu_ref, wsig_ref, eps_in_ref, vec_ref, o_ref):
    # Reassociated factorized-noise math; weight tiles go straight to the MXU.
    cdt = wmu_ref.dtype                                   # compute/storage dtype of weights
    x = x_ref[...]                                        # (B, In) f32
    xn = x * eps_in_ref[...]                              # (B, In) * (1, In)
    y_mu = jnp.dot(x.astype(cdt), wmu_ref[...],
                   preferred_element_type=jnp.float32)    # (B, TILE_N) f32
    y_sig = jnp.dot(xn.astype(cdt), wsig_ref[...],
                    preferred_element_type=jnp.float32)
    eps_out = vec_ref[0:1, :]                             # (1, TILE_N)
    b_mu = vec_ref[1:2, :]
    b_sig = vec_ref[2:3, :]
    y = y_mu + y_sig * eps_out + (b_mu + b_sig * eps_out)
    o_ref[...] = y.astype(o_ref.dtype)


def _mu_eval_kernel(x_ref, wmu_ref, vec_ref, o_ref):
    cdt = wmu_ref.dtype
    y = jnp.dot(x_ref[...].astype(cdt), wmu_ref[...],
                preferred_element_type=jnp.float32)
    o_ref[...] = (y + vec_ref[1:2, :]).astype(o_ref.dtype)   # row 1 = bias_mu


# ----------------------------- tiling -------------------------------------- #

def _choose_tile_n(out_p, in_features, b_pad, w_bytes, n_w, tile_n=None):
    """Pick an Out tile: multiple of 128, divides out_p, >=2 grid steps when
    possible (v7x: 2 TensorCores), <=512 wide, within the VMEM budget."""
    if tile_n is not None:
        t = min(out_p, _round_up(max(int(tile_n), _LANE), _LANE))
        while out_p % t:
            t -= _LANE
        return t
    if out_p <= _LANE:
        return out_p
    t = max(_LANE, min(512, (out_p // 2 // _LANE) * _LANE))
    while out_p % t:
        t -= _LANE

    def vmem(tt):
        return (n_w * 2 * in_features * tt * w_bytes      # weight tiles, double-buffered
                + 2 * b_pad * in_features * 4             # x
                + 2 * b_pad * tt * 4                      # output tile
                + 2 * (_SUBLANE * tt + in_features) * 4)  # packed vec + eps_in

    while t > _LANE and vmem(t) > _VMEM_BUDGET:
        t -= _LANE
        while out_p % t:
            t -= _LANE
    return t


# ----------------------------- wrapper -------------------------------------- #

def noisy_linear(x, params, *, training=True, tile_n=None):
    """Fused NoisyLinear forward.  `params` comes from init_noisy_linear."""
    B, In = x.shape
    assert In == params["in_features"]
    Out = params["out_features"]
    w_mu = params["weight_mu_t"]                # (In, out_p), weight dtype
    out_p = w_mu.shape[1]
    w_bytes = jnp.dtype(w_mu.dtype).itemsize

    # sublane-dense batch (cheap pad on the small activation only)
    b_pad = _round_up(max(B, 1), _SUBLANE)
    xp = jnp.pad(x, ((0, b_pad - B), (0, 0))) if b_pad != B else x

    n_w = 2 if training else 1
    t = _choose_tile_n(out_p, In, b_pad, w_bytes, n_w, tile_n)
    grid = (out_p // t,)

    x_spec = pl.BlockSpec((b_pad, In), lambda j: (0, 0))
    w_spec = pl.BlockSpec((In, t), lambda j: (0, j))
    vec_spec = pl.BlockSpec((_SUBLANE, t), lambda j: (0, j))
    out_spec = pl.BlockSpec((b_pad, t), lambda j: (0, j))

    cparams = pltpu.CompilerParams(
        dimension_semantics=("parallel",),       # Out tiles shard across v7x's 2 TCs
        vmem_limit_bytes=_VMEM_LIMIT)

    cost = pl.CostEstimate(
        flops=2 * b_pad * In * out_p * n_w,
        transcendentals=0,
        bytes_accessed=(n_w * In * out_p * w_bytes + b_pad * In * 4
                        + _SUBLANE * out_p * 4 + In * 4 + b_pad * out_p * 4))

    if training:
        y = pl.pallas_call(
            _noisy_train_kernel,
            out_shape=jax.ShapeDtypeStruct((b_pad, out_p), x.dtype),
            grid=grid,
            in_specs=[
                x_spec,                                    # x            (B, In)
                w_spec,                                    # weight_mu^T  (In, TILE_N)
                w_spec,                                    # weight_sig^T (In, TILE_N)
                pl.BlockSpec((1, In), lambda j: (0, 0)),   # eps_in row   (1, In)
                vec_spec,                                  # [eps_out; b_mu; b_sig] (8, TILE_N)
            ],
            out_specs=out_spec,
            compiler_params=cparams,
            cost_estimate=cost,
        )(xp, w_mu, params["weight_sigma_t"], params["eps_in"], params["vec"])
    else:
        y = pl.pallas_call(
            _mu_eval_kernel,
            out_shape=jax.ShapeDtypeStruct((b_pad, out_p), x.dtype),
            grid=grid,
            in_specs=[x_spec, w_spec, vec_spec],
            out_specs=out_spec,
            compiler_params=cparams,
            cost_estimate=cost,
        )(xp, w_mu, params["vec"])

    if b_pad != B or out_p != Out:
        y = y[:B, :Out]
    return y


# ----------------------------- init (matches PyTorch) ----------------------- #

def _scale_noise(key, size):
    # matches torch: x.sign() * x.abs().sqrt()
    x = jax.random.normal(key, (size,), dtype=jnp.float32)
    return jnp.sign(x) * jnp.sqrt(jnp.abs(x))


def init_noisy_linear(key, in_features, out_features, std_init=0.5,
                      weight_dtype=jnp.bfloat16):
    """Kernel-ready parameters: weights transposed (In, Out_padded), padded
    once, optionally bf16; eps_out/bias_mu/bias_sigma packed into (8, Out_p)."""
    k_wmu, k_bmu, k_ein, k_eout = jax.random.split(key, 4)
    mu_range = 1.0 / np.sqrt(in_features)
    out_p = _round_up(out_features, _LANE)
    pad = out_p - out_features

    w_mu = jax.random.uniform(k_wmu, (in_features, out_features), jnp.float32,
                              minval=-mu_range, maxval=mu_range)
    w_sig = jnp.full((in_features, out_features),
                     std_init / np.sqrt(in_features), jnp.float32)
    if pad:
        w_mu = jnp.pad(w_mu, ((0, 0), (0, pad)))
        w_sig = jnp.pad(w_sig, ((0, 0), (0, pad)))
    b_mu = jax.random.uniform(k_bmu, (out_features,), jnp.float32,
                              minval=-mu_range, maxval=mu_range)
    b_sig = jnp.full((out_features,), std_init / np.sqrt(out_features),
                     jnp.float32)

    # reset_noise(): keep the FACTORIZED noise; weight_epsilon = outer(eps_out, eps_in)
    eps_in = _scale_noise(k_ein, in_features)
    eps_out = _scale_noise(k_eout, out_features)

    vec = jnp.zeros((_SUBLANE, out_p), jnp.float32)
    vec = vec.at[0, :out_features].set(eps_out)     # row 0: eps_out (== bias_epsilon)
    vec = vec.at[1, :out_features].set(b_mu)        # row 1: bias_mu
    vec = vec.at[2, :out_features].set(b_sig)       # row 2: bias_sigma

    return dict(
        weight_mu_t=w_mu.astype(weight_dtype),
        weight_sigma_t=w_sig.astype(weight_dtype),
        eps_in=eps_in.reshape(1, in_features),
        vec=vec,
        in_features=in_features,
        out_features=out_features,
    )


# ----------------------------- test ----------------------------------------- #

def _reference(x, params, training):
    # Algebraically identical to the PyTorch formula; mirrors the kernel's
    # dtype handling (weights possibly bf16, f32 accumulation).
    Out = params["out_features"]
    wdt = params["weight_mu_t"].dtype
    hi = jax.lax.Precision.HIGHEST
    wmu = params["weight_mu_t"][:, :Out].astype(jnp.float32)
    b_mu = params["vec"][1, :Out]
    xc = x.astype(wdt).astype(jnp.float32)
    if not training:
        return jnp.dot(xc, wmu, precision=hi) + b_mu
    wsig = params["weight_sigma_t"][:, :Out].astype(jnp.float32)
    eps_in = params["eps_in"][0]
    eps_out = params["vec"][0, :Out]
    b_sig = params["vec"][2, :Out]
    xnc = (x * eps_in).astype(wdt).astype(jnp.float32)
    return (jnp.dot(xc, wmu, precision=hi)
            + jnp.dot(xnc, wsig, precision=hi) * eps_out
            + (b_mu + b_sig * eps_out))


if __name__ == "__main__":
    key = jax.random.PRNGKey(0)
    cases = [
        # (B, In, Out, weight_dtype, tol)
        (8, 128, 256, jnp.bfloat16, 2e-3),   # lane-dense, 2 Out tiles, bf16 weights
        (4, 64, 96, jnp.float32, 1e-4),      # ragged B/Out (padded internally), f32 weights
    ]
    for i, (B, In, Out, wdt, tol) in enumerate(cases):
        k_p, k_x = jax.random.split(jax.random.fold_in(key, i))
        params = init_noisy_linear(k_p, In, Out, std_init=0.5, weight_dtype=wdt)
        x = jax.random.normal(k_x, (B, In), dtype=jnp.float32)
        for training in (True, False):
            y = noisy_linear(x, params, training=training)
            y = jax.block_until_ready(y)
            ref = _reference(x, params, training)
            np.testing.assert_allclose(np.asarray(y), np.asarray(ref),
                                       rtol=tol, atol=tol)

    print("KERNEL_OK")
</pallas_src>

<mosaic_0001>
module attributes {stable_mosaic.version = 11 : i64} {
  func.func @_noisy_train_kernel(%arg0: i32, %arg1: memref<8x128xf32, #tpu.memory_space<vmem>>, %arg2: memref<128x128xbf16, #tpu.memory_space<vmem>>, %arg3: memref<128x128xbf16, #tpu.memory_space<vmem>>, %arg4: memref<1x128xf32, #tpu.memory_space<vmem>>, %arg5: memref<8x128xf32, #tpu.memory_space<vmem>>, %arg6: memref<8x128xf32, #tpu.memory_space<vmem>>) attributes {dimension_semantics = [#tpu.dimension_semantics<parallel>], iteration_bounds = array<i64: 2>, scalar_prefetch = 0 : i64, scratch_operands = 0 : i64, tpu.core_type = #tpu.core_type<tc>, window_params = [{pipeline_mode = #tpu.pipeline_mode<synchronous>, transform_indices = @transform_0, window_bounds = array<i64: 8, 128>}, {transform_indices = @transform_1, window_bounds = array<i64: 128, 128>}, {transform_indices = @transform_2, window_bounds = array<i64: 128, 128>}, {pipeline_mode = #tpu.pipeline_mode<synchronous>, transform_indices = @transform_3, window_bounds = array<i64: 1, 128>}, {transform_indices = @transform_4, window_bounds = array<i64: 8, 128>}, {transform_indices = @transform_5, window_bounds = array<i64: 8, 128>}]} {
    %c0 = arith.constant 0 : index
    %c0_0 = arith.constant 0 : index
    %0 = vector.load %arg1[%c0, %c0_0] : memref<8x128xf32, #tpu.memory_space<vmem>>, vector<8x128xf32>
    %c0_1 = arith.constant 0 : index
    %c0_2 = arith.constant 0 : index
    %1 = vector.load %arg4[%c0_1, %c0_2] : memref<1x128xf32, #tpu.memory_space<vmem>>, vector<1x128xf32>
    %2 = vector.broadcast %1 : vector<1x128xf32> to vector<8x128xf32>
    %3 = arith.mulf %0, %2 : vector<8x128xf32>
    %4 = arith.truncf %0 : vector<8x128xf32> to vector<8x128xbf16>
    %c0_3 = arith.constant 0 : index
    %c0_4 = arith.constant 0 : index
    %5 = vector.load %arg2[%c0_3, %c0_4] : memref<128x128xbf16, #tpu.memory_space<vmem>>, vector<128x128xbf16>
    %cst = arith.constant dense<0.000000e+00> : vector<8x128xf32>
    %6 = tpu.matmul %4, %5, %cst {dimension_numbers = #tpu.dot_dimension_numbers<[1], [0], [0], [1], [0, 0, 1, 1], [], []>} : vector<8x128xbf16>, vector<128x128xbf16>, vector<8x128xf32> -> vector<8x128xf32>
    %7 = arith.truncf %3 : vector<8x128xf32> to vector<8x128xbf16>
    %c0_5 = arith.constant 0 : index
    %c0_6 = arith.constant 0 : index
    %8 = vector.load %arg3[%c0_5, %c0_6] : memref<128x128xbf16, #tpu.memory_space<vmem>>, vector<128x128xbf16>
    %cst_7 = arith.constant dense<0.000000e+00> : vector<8x128xf32>
    %9 = tpu.matmul %7, %8, %cst_7 {dimension_numbers = #tpu.dot_dimension_numbers<[1], [0], [0], [1], [0, 0, 1, 1], [], []>} : vector<8x128xbf16>, vector<128x128xbf16>, vector<8x128xf32> -> vector<8x128xf32>
    %c0_8 = arith.constant 0 : index
    %c0_9 = arith.constant 0 : index
    %10 = vector.load %arg5[%c0_8, %c0_9] : memref<8x128xf32, #tpu.memory_space<vmem>>, vector<1x128xf32>
    %c1 = arith.constant 1 : index
    %c0_10 = arith.constant 0 : index
    %11 = vector.load %arg5[%c1, %c0_10] : memref<8x128xf32, #tpu.memory_space<vmem>>, vector<1x128xf32>
    %c2 = arith.constant 2 : index
    %c0_11 = arith.constant 0 : index
    %12 = vector.load %arg5[%c2, %c0_11] : memref<8x128xf32, #tpu.memory_space<vmem>>, vector<1x128xf32>
    %13 = vector.broadcast %10 : vector<1x128xf32> to vector<8x128xf32>
    %14 = arith.mulf %9, %13 : vector<8x128xf32>
    %15 = arith.addf %6, %14 : vector<8x128xf32>
    %16 = arith.mulf %12, %10 : vector<1x128xf32>
    %17 = arith.addf %11, %16 : vector<1x128xf32>
    %18 = vector.broadcast %17 : vector<1x128xf32> to vector<8x128xf32>
    %19 = arith.addf %15, %18 : vector<8x128xf32>
    %c0_12 = arith.constant 0 : index
    %c0_13 = arith.constant 0 : index
    %20 = vector.load %arg6[%c0_12, %c0_13] : memref<8x128xf32, #tpu.memory_space<vmem>>, vector<8x128xf32>
    tpu.vector_store %arg6[%c0_12, %c0_13], %19 {strides = array<i32>} : memref<8x128xf32, #tpu.memory_space<vmem>>, vector<8x128xf32>,
    return
  }
  func.func @transform_0(%arg0: i32) -> (i32, i32) {
    %c0_i32 = arith.constant 0 : i32
    %c0_i32_0 = arith.constant 0 : i32
    %c0_i32_1 = arith.constant 0 : i32
    return %c0_i32, %c0_i32_0 : i32, i32
  }
  func.func @transform_1(%arg0: i32) -> (i32, i32) {
    %c0_i32 = arith.constant 0 : i32
    %c0_i32_0 = arith.constant 0 : i32
    return %c0_i32, %arg0 : i32, i32
  }
  func.func @transform_2(%arg0: i32) -> (i32, i32) {
    %c0_i32 = arith.constant 0 : i32
    %c0_i32_0 = arith.constant 0 : i32
    return %c0_i32, %arg0 : i32, i32
  }
  func.func @transform_3(%arg0: i32) -> (i32, i32) {
    %c0_i32 = arith.constant 0 : i32
    %c0_i32_0 = arith.constant 0 : i32
    %c0_i32_1 = arith.constant 0 : i32
    return %c0_i32, %c0_i32_0 : i32, i32
  }
  func.func @transform_4(%arg0: i32) -> (i32, i32) {
    %c0_i32 = arith.constant 0 : i32
    %c0_i32_0 = arith.constant 0 : i32
    return %c0_i32, %arg0 : i32, i32
  }
  func.func @transform_5(%arg0: i32) -> (i32, i32) {
    %c0_i32 = arith.constant 0 : i32
    %c0_i32_0 = arith.constant 0 : i32
    return %c0_i32, %arg0 : i32, i32
  }
}

</mosaic_0001>

<bundles_post_ra>
// kernel: tpu_custom_call.1
= control target key start
LH: loop header
LB: loop body
LE: loop exit
PB: predicated region body
PF: predicated region fallthrough
CT: control target
= control target key end

     0   :  { %s1440_s0 = inlined_call_operand.hbm [shape: f32[8,128], index: 0, kind: input, shape index: {}]   ;;  %s1441_s1 = inlined_call_operand.hbm [shape: bf16[128,256], index: 1, kind: input, shape index: {}]   ;;  %s1442_s2 = inlined_call_operand.hbm [shape: bf16[128,256], index: 2, kind: input, shape index: {}]   ;;  %s1443_s3 = inlined_call_operand.vmem [shape: f32[1,128], index: 3, kind: input, shape index: {}]   ;;  %s1444_s4 = inlined_call_operand.hbm [shape: f32[8,256], index: 4, kind: input, shape index: {}]   ;;  %s1445_s5 = inlined_call_operand.hbm [shape: f32[8,256], index: 5, kind: output, shape index: {}]  }
   0x1   :  { %1462 = sst [smem:[#allocation19_spill]] %s1441_s1 }
   0x2   :  { %1463 = sst [smem:[#allocation20_spill]] %s1442_s2 }
   0x3   :  { %10 = vsyncpa [#allocation3], 0 }
   0x4   :  { %11 = vsyncpa [#allocation6], 0 }
   0x5   :  { %13 = vsyncpa [#allocation6 + $0x1], 0 }
   0x6   :  { %14 = vsyncpa [#allocation9], 0 }
   0x7   :  { %16 = vsyncpa [#allocation9 + $0x1], 0 }
   0x8   :  { %17 = vsyncpa [#allocation4], 0 }
   0x9   :  { %19 = vsyncpa [#allocation4 + $0x1], 0  ;;  %s1120_s18 = smov 0   ;;  %s1122_s19 = smov 0  }
   0xa   :  { %s1124_s20 = smov 0   ;;  %s1126_s21 = smov 0  }
   0xb LB: > { %1464 = sst [smem:[#allocation15_spill]] %s1074_s20  ;;  %s1141_s22 = sadd.s32 1, %s1078_s21   ;;  %s1078_s21 = sphi %s1126_s21, %s1494_s21   ;;  %s1074_s20 = sphi %s1124_s20, %s1496_s20   ;;  %s1070_s19 = sphi %s1122_s19, %s1498_s19   ;;  %s1066_s18 = sphi %s1120_s18, %s1497_s18  }
   0xc   : > { %1465 = sst [smem:[#allocation16_spill]] %s1141_s22  ;;  %s53_s23 = sadd.s32 1, %s1074_s20 }
   0xd   : > { %s50_s24 = ssub.s32 %s1078_s21, %s1141_s22  ;;  %p1446_p0 = scmp.ne.s32.totalorder %s1074_s20, %s1070_s19 }
   0xe   : > { %p51_p1 = scmp.eq.s32.totalorder %s50_s24, 0  ;;  %p61_p2 = scmp.eq.s32.totalorder %s1078_s21, 0 }
   0xf   : > { %p829_p4 = scmp.lt.s32.totalorder %s1078_s21, 2  ;;  %s203_s26 = sand.u32 1, %s1078_s21  }
  0x10   : > { %s1152_s25 = scalar_select %p51_p1, %s1074_s20, %s53_s23  }
  0x11   : > { %p62_p5 = por %p61_p2, %p1446_p0  ;;  %s1159_s27 = sand.u32 1, %s1074_s20  }
  0x12   : > { %1466 = sst [smem:[#allocation17_spill]] %s1152_s25  ;;  %s707_s28 = sshll.u32 %s1159_s27, 6 }
  0x13   : > { %s708_s29 = sshll.u32 %s1078_s21, 6  ;;  %s1467_s1 = sld [smem:[#allocation19_spill]] }
  0x14   : > { %s207_s8 = scalar_lea.vmem [#allocation5], %s707_s28  ;;  %p1172_p6 = pnand %p829_p4, %p62_p5 }
  0x15   : > { %s213_s9 = sshll.u32 %s207_s8, 4  ;;  %s1178_s11 = scalar_lea.sflag [#allocation6], %s203_s26  ;;  %s1176_s9 = int_to_ptr.vmem [resolvable:$true] %s213_s9 }
  0x16   : > { %s1468_s10 = scalar_select %p1172_p6, 1, 0 }
  0x17   : > { %p1184_p8 = pneg %p1172_p6 }
  0x19   : > { %s1168_s7 = scalar_lea.hbm %s1467_s1, %s708_s29  ;;  %s891_s16 = scalar_lea.hbm %s1467_s1, 2048 }
  0x1a   : > { %s886_s12 = scalar_lea.hbm %s1168_s7, 1024  ;;  %p892_p11 = scmp.lt.u32.totalorder %s1168_s7, %s1467_s1 }
  0x1b   : > { %p887_p7 = scmp.ne.s32.totalorder %s1168_s7, %s886_s12  ;;  %p893_p12 = scmp.lt.u32.totalorder %s891_s16, %s886_s12 }
  0x1c   : > { %s1469_s13 = scalar_select %p1184_p8, 1, 0 }
  0x1d   : > { %p889_p9 = pnand %p1184_p8, %p887_p7  ;;  %p894_p13 = por %p893_p12, %p892_p11 }
  0x1e   : > { %p895_p1 = scmp.lt.u32.totalorder %s886_s12, %s1168_s7 }
  0x1f   : > { %p890_p10 = pneg %p889_p9 }
  0x20   : > { %p896_p2 = por %p895_p1, %p894_p13 }
  0x22   : > { %p897_p4 = pnand %p896_p2, %p890_p10 }
  0x24   : > { %900 = shalt.err (!%p897_p4)
}
  0x25   : > { %s901_s24 = scalar_lea.vmem %s1176_s9, 1024  ;;  %s1080_s26 = smov [#allocation5]  }
  0x26   : > { %p902_p5 = scmp.ne.s32.totalorder %s1176_s9, %s901_s24  ;;  %s906_s30 = sshll.u32 %s1080_s26, 4  ;;  %s907_s30 = int_to_ptr.vmem [resolvable:$false] %s906_s30 }
  0x27   : > { %s908_s6 = scalar_lea.vmem %s907_s30, 2048  ;;  %p909_p3 = scmp.lt.s32.totalorder %s1176_s9, %s907_s30 }
  0x28   : > { %p904_p7 = pnand %p902_p5, %p1184_p8  ;;  %p910_p0 = scmp.lt.s32.totalorder %s908_s6, %s901_s24 }
  0x2a   : > { %p905_p9 = pneg %p904_p7  ;;  %p911_p11 = por %p910_p0, %p909_p3 }
  0x2c   : > { %p912_p12 = pnand %p911_p11, %p905_p9 }
  0x2e   : > { %915 = shalt.err (!%p912_p12)
}
  0x2f   : > { %s1447_s8 = smov 128   ;;  %s1448_s12 = smov 64  }
  0x30   : > { %s1449_s14 = smov 4   ;;  %s1470_s2 = sld [smem:[#allocation20_spill]] }
  0x31   : > { %817 = dma.hbm_to_vmem [thread:$0]  (!%p1172_p6), %s1168_s7, 1024, %s1176_s9, %s1178_s11, %s1447_s8, %s1448_s12, %s1449_s14  }
  0x32   : > { %s227_s23 = scalar_lea.vmem [#allocation7], %s707_s28  ;;  %s1223_s26 = sadd.s32 4294967295, %s1078_s21  }
  0x33   : > { %s233_s24 = sshll.u32 %s227_s23, 4  ;;  %s703_s30 = sadd.s32 4294967294, %s1078_s21   ;;  %s1220_s24 = int_to_ptr.vmem [resolvable:$true] %s233_s24 }
  0x34   : > { %p66_p0 = scmp.ne.s32.totalorder %s1070_s19, %s1066_s18  ;;  %p1450_p3 = scmp.eq.s32.totalorder %s1223_s26, 0 }
  0x35   : > { %p163_p10 = scmp.eq.s32.totalorder %s1223_s26, 1  ;;  %p169_p13 = scmp.eq.s32.totalorder %s703_s30, 1 }
  0x36   : > { %s1216_s17 = scalar_lea.hbm %s1470_s2, %s708_s29  ;;  %p704_p1 = scmp.ge.s32.totalorder %s1078_s21, 1 }
  0x37   : > { %p1233_p2 = por %p1450_p3, %p66_p0  ;;  %p1472_p4 = scmp.ne.s32.totalorder %s1074_s20, %s1070_s19 }
  0x38   : > { %p1244_p7 = por %p169_p13, %p66_p0  ;;  %p176_p9 = scmp.lt.s32.totalorder %s1078_s21, 3 }
  0x39   : > { %s1471_s28 = scalar_select %p1233_p2, 1, 0 }
  0x3a   : > { %p1240_p5 = por %p163_p10, %p1472_p4  ;;  %p1249_p11 = pnand %p704_p1, %p176_p9 }
  0x3b   : > { %s1474_s7 = scalar_select %p1244_p7, 1, 0 }
  0x3c   : > { %s1473_s29 = scalar_select %p1240_p5, 1, 0 }
  0x3d   : > { %1475 = sst [smem:[#allocation18_spill]] %s1474_s7  ;;  %s1084_s6 = smov [#allocation2]  }
  0x3e   : > { %s1476_s9 = scalar_select %p1249_p11, 1, 0 }
  0x3f   : > { %s189_s15 = sshll.u32 %s1084_s6, 4  ;;  %s711_s16 = sshll.u32 %s1159_s27, 3  ;;  %s1253_s15 = int_to_ptr.vmem [resolvable:$true] %s189_s15 }
  0x40   : > { %s916_s23 = scalar_lea.hbm %s1216_s17, 1024  ;;  %s921_s12 = scalar_lea.hbm %s1470_s2, 2048 }
  0x41   : > { %p917_p10 = scmp.ne.s32.totalorder %s1216_s17, %s916_s23  ;;  %p922_p1 = scmp.lt.u32.totalorder %s1216_s17, %s1470_s2 }
  0x42   : > { %p923_p4 = scmp.lt.u32.totalorder %s921_s12, %s916_s23  ;;  %p925_p3 = scmp.lt.u32.totalorder %s916_s23, %s1216_s17 }
  0x43   : > { %p919_p0 = pnand %p917_p10, %p1184_p8 }
  0x44   : > { %p924_p9 = por %p923_p4, %p922_p1 }
  0x45   : > { %p920_p13 = pneg %p919_p0 }
  0x46   : > { %p926_p7 = por %p925_p3, %p924_p9 }
  0x48   : > { %p927_p5 = pnand %p926_p7, %p920_p13 }
  0x4a   : > { %930 = shalt.err (!%p927_p5)
}
  0x4b   : > { %s931_s6 = scalar_lea.vmem %s1220_s24, 1024  ;;  %s1085_s8 = smov [#allocation7]  }
  0x4c   : > { %p932_p10 = scmp.ne.s32.totalorder %s1220_s24, %s931_s6  ;;  %s936_s30 = sshll.u32 %s1085_s8, 4  ;;  %s937_s30 = int_to_ptr.vmem [resolvable:$false] %s936_s30 }
  0x4d   : > { %s938_s1 = scalar_lea.vmem %s937_s30, 2048  ;;  %p939_p2 = scmp.lt.s32.totalorder %s1220_s24, %s937_s30 }
  0x4e   : > { %p934_p0 = pnand %p932_p10, %p1184_p8  ;;  %p940_p11 = scmp.lt.s32.totalorder %s938_s1, %s931_s6 }
  0x50   : > { %p935_p12 = pneg %p934_p0  ;;  %p941_p1 = por %p940_p11, %p939_p2 }
  0x52   : > { %p942_p4 = pnand %p941_p1, %p935_p12 }
  0x54   : > { %945 = shalt.err (!%p942_p4)
}
  0x55   : > { %s1477_s12 = smov 4   ;;  %s1478_s14 = smov 64  }
  0x56   : > { %s1479_s23 = smov 128   ;;  %p1480_p3 = scmp.eq.s32.totalorder %s1223_s26, 0 }
  0x57   : > { %820 = dma.hbm_to_vmem [thread:$0]  (!%p1172_p6), %s1216_s17, 1024, %s1220_s24, %s1178_s11, %s1479_s23, %s1478_s14, %s1477_s12  }
  0x58   : > { %p1481_p5 = scmp.ne.s32.totalorder %s1476_s9, 0  ;;  %s712_s8 = sshll.u32 %s1078_s21, 7 }
  0x59   : > { %s247_s30 = scalar_lea.vmem [#allocation8], %s711_s16  ;;  %s1298_s20 = scalar_lea.hbm %s1444_s4, %s712_s8 }
  0x5a   : > { %p1482_p7 = pneg %p1481_p5  ;;  %s254_s1 = sshll.u32 %s247_s30, 4  ;;  %s255_s1 = int_to_ptr.vmem [resolvable:$true] %s254_s1 }
  0x5b   : > { %s946_s11 = scalar_lea.hbm %s1440_s0, 128 }
  0x5c   : > { %p1288_p13 = pnand %p1482_p7, %p1480_p3  ;;  %p947_p2 = scmp.ne.s32.totalorder %s1440_s0, %s946_s11 }
  0x5d   : > { %p953_p10 = scmp.lt.u32.totalorder %s946_s11, %s1440_s0 }
  0x5e   : > { %p948_p11 = pneg %p1288_p13 }
  0x60   : > { %p949_p12 = pnand %p948_p11, %p947_p2 }
  0x62   : > { %p950_p9 = pneg %p949_p12 }
  0x64   : > { %p955_p0 = pnand %p953_p10, %p950_p9 }
  0x66   : > { %958 = shalt.err (!%p955_p0)
}
  0x67   : > { %s959_s2 = scalar_lea.vmem %s1253_s15, 128  ;;  %p967_p7 = scmp.lt.s32.totalorder %s1253_s15, %s1253_s15 }
  0x68   : > { %p960_p1 = scmp.ne.s32.totalorder %s1253_s15, %s959_s2  ;;  %p968_p5 = scmp.lt.s32.totalorder %s959_s2, %s959_s2 }
  0x6a   : > { %p962_p4 = pnand %p960_p1, %p948_p11  ;;  %p969_p6 = por %p968_p5, %p967_p7 }
  0x6c   : > { %p963_p3 = pneg %p962_p4 }
  0x6e   : > { %p970_p8 = pnand %p969_p6, %p963_p3 }
  0x70   : > { %973 = shalt.err (!%p970_p8)
}
  0x71   : > { %813 = dma.hbm_to_vmem [thread:$0]  (!%p1288_p13), %s1440_s0, 128, %s1253_s15, [#allocation3]  }
  0x72   : > { %s244_s7 = scalar_lea.sflag [#allocation9], %s1159_s27  ;;  %s974_s14 = scalar_lea.hbm %s1298_s20, 128 }
  0x73   : > { %p975_p2 = scmp.ne.s32.totalorder %s1298_s20, %s974_s14  ;;  %p1484_p5 = scmp.ne.s32.totalorder %s1469_s13, 0 }
  0x74   : > { %s979_s8 = scalar_lea.hbm %s1444_s4, 256  ;;  %p980_p11 = scmp.lt.u32.totalorder %s1298_s20, %s1444_s4 }
  0x75   : > { %p977_p6 = pnand %p975_p2, %p1484_p5  ;;  %p981_p12 = scmp.lt.u32.totalorder %s979_s8, %s974_s14 }
  0x76   : > { %p983_p10 = scmp.lt.u32.totalorder %s974_s14, %s1298_s20 }
  0x77   : > { %p978_p8 = pneg %p977_p6  ;;  %p982_p9 = por %p981_p12, %p980_p11 }
  0x79   : > { %p984_p0 = por %p983_p10, %p982_p9 }
  0x7b   : > { %p985_p13 = pnand %p984_p0, %p978_p8 }
  0x7d   : > { %988 = shalt.err (!%p985_p13)
}
  0x7e   : > { %s989_s27 = scalar_lea.vmem %s255_s1, 128  ;;  %s1086_s15 = smov [#allocation8]  }
  0x7f   : > { %p990_p1 = scmp.ne.s32.totalorder %s255_s1, %s989_s27  ;;  %s994_s17 = sshll.u32 %s1086_s15, 4  ;;  %s995_s17 = int_to_ptr.vmem [resolvable:$false] %s994_s17 }
  0x80   : > { %s996_s24 = scalar_lea.vmem %s995_s17, 256  ;;  %p997_p7 = scmp.lt.s32.totalorder %s255_s1, %s995_s17 }
  0x81   : > { %p992_p4 = pnand %p990_p1, %p1484_p5  ;;  %p998_p2 = scmp.lt.s32.totalorder %s996_s24, %s989_s27 }
  0x83   : > { %p993_p3 = pneg %p992_p4  ;;  %p999_p6 = por %p998_p2, %p997_p7 }
  0x85   : > { %p1000_p11 = pnand %p999_p6, %p993_p3 }
  0x87   : > { %1003 = shalt.err (!%p1000_p11)
}
  0x88   : > { %p1485_p12 = scmp.ne.s32.totalorder %s1468_s10, 0  ;;  %p1486_p8 = scmp.ne.s32.totalorder %s1476_s9, 0 }
  0x89   : > { %p1487_p9 = scmp.eq.s32.totalorder (!%p1486_p8), %s1223_s26, 0 }
  0x8a   : > { %823 = dma.hbm_to_vmem [thread:$0]  (!%p1485_p12), %s1298_s20, 128, %s255_s1, %s244_s7  }
  0x8b   : > { %263 = sbr.rel (%p1486_p8) target bundleno = 421 (0x1a5), region = 40 }
  0x92   : > { %1049 = dma.done.wait (%p1487_p9), [#allocation3], 128   ;;  %p1488_p5 = pmov %p1487_p9 }
  0x93   : > { %s269_s13 = sand.u32 1, %s1223_s26   ;;  %s1347_s12 = sand.u32 1, %s1070_s19  }
  0x94   : > { %1051 = vsyncadd (%p1488_p5), [#allocation3], 4294967168  ;;  %s715_s16 = sshll.u32 %s1347_s12, 6  ;;  %s270_s10 = scalar_lea.sflag [#allocation6], %s269_s13 }
  0x95   : > { %s1350_s2 = scalar_lea.vmem [#allocation5], %s715_s16  ;;  %p1489_p10 = scmp.ne.s32.totalorder %s1471_s28, 0 }
  0x97   : > { %1053 = dma.done.wait (%p1489_p10), %s270_s10, 2048  }
  0x98   : > { %1055 = vsyncadd (%p1489_p10), %s270_s10, 4294965248  ;;  %s717_s20 = sshll.u32 %s1347_s12, 3  ;;  %s1357_s9 = scalar_lea.vmem [#allocation7], %s715_s16 }
  0x99   : > { %s288_s1 = scalar_lea.sflag [#allocation9], %s1347_s12  ;;  %s1362_s22 = scalar_lea.vmem [#allocation8], %s717_s20 }
  0x9a   : > { %1057 = dma.done.wait (%p1489_p10), %s288_s1, 128  }
  0x9b   : > { %1059 = vsyncadd (%p1489_p10), %s288_s1, 4294967168  ;;  %v1087_v0 = vmov 0.0   ;;  %vm1088_vm0 = vmmov 0   ;;  %v870_v1 = vld [vmem:[%s1357_s9] sm:$0xff]   ;;  %v872_v3 = vld [vmem:[%s1357_s9 + $0x8] sm:$0xff]   ;;  %v463_v22 = vlaneseq  ;;  %s737_s7 = sshll.u32 %s1223_s26, 7 }
  0x9c   : > { %758 = vmatprep.subr.bf16.mxu0 %v1087_v0  ;;  %778 = vmatprep.subr.bf16.mxu1 %v1087_v0  ;;  %v871_v2 = vld [vmem:[%s1350_s2] sm:$0xff]   ;;  %v873_v4 = vld [vmem:[%s1350_s2 + $0x8] sm:$0xff]   ;;  %v874_v5 = vld [vmem:[%s1357_s9 + $0x10] sm:$0xff]   ;;  %s327_s14 = scalar_lea.vmem [#allocation10], %s717_s20  ;;  %s1396_s30 = scalar_lea.hbm %s1445_s5, %s737_s7 }
  0x9d   : > { %774 = vmatprep.mubr.msk.bf16.mxu0 %vm1088_vm0, %v1087_v0  ;;  %794 = vmatprep.mubr.msk.bf16.mxu1 %vm1088_vm0, %v1087_v0  ;;  %v875_v6 = vld [vmem:[%s1350_s2 + $0x10] sm:$0xff]   ;;  %v876_v7 = vld [vmem:[%s1357_s9 + $0x18] sm:$0xff]   ;;  %v878_v9 = vld [vmem:[%s1357_s9 + $0x20] sm:$0xff]   ;;  %v464_v23 = vshrl.u32 %v463_v22, 7  ;;  %s578_s23 = sshll.u32 %s327_s14, 4  ;;  %s565_s26 = scalar_lea.sflag [#allocation4], %s1347_s12  ;;  %s1398_s23 = int_to_ptr.vmem [resolvable:$true] %s578_s23 }
  0x9e   : > { %759 = vmatpush3.bf16.msra.mxu0 %v870_v1  ;;  %779 = vmatpush3.bf16.msra.mxu1 %v871_v2  ;;  %v877_v8 = vld [vmem:[%s1350_s2 + $0x18] sm:$0xff]   ;;  %v879_v10 = vld [vmem:[%s1350_s2 + $0x20] sm:$0xff]   ;;  %v880_v11 = vld [vmem:[%s1357_s9 + $0x28] sm:$0xff]   ;;  %s1004_s11 = scalar_lea.vmem %s1398_s23, 128  ;;  %p1490_p13 = scmp.ne.s32.totalorder %s1473_s29, 0 }
  0x9f   : > { %760 = vmatprep.subr.bf16.mxu0 %v1087_v0  ;;  %780 = vmatprep.subr.bf16.mxu1 %v1087_v0  ;;  %v881_v12 = vld [vmem:[%s1350_s2 + $0x28] sm:$0xff]   ;;  %v882_v13 = vld [vmem:[%s1357_s9 + $0x30] sm:$0xff]   ;;  %v329_v14 = vld [vmem:[#allocation2] sm:$0xff]  ;;  %v465_v26 = vsub.s32 0, %v464_v23  ;;  %p1005_p0 = scmp.ne.s32.totalorder %s1398_s23, %s1004_s11  ;;  %s1089_s27 = smov [#allocation10]  }
  0xa0   : > { %v719_v15 = vld [vmem:[%s1443_s3] ss:$0 sm:$0xff]  ;;  %v883_v16 = vld [vmem:[%s1350_s2 + $0x30] sm:$0xff]   ;;  %v338_v21 = vpack.c.bf16 %v329_v14, %v329_v14  ;;  %v460_v24 = vld [vmem:[%s1362_s22] sm:$0x1]  ;;  %s1008_s15 = sshll.u32 %s1089_s27, 4  ;;  %s1009_s15 = int_to_ptr.vmem [resolvable:$false] %s1008_s15 }
  0xa1   : > { %v337_v17 = vmul.f32 %v719_v15, %v329_v14  ;;  %v884_v18 = vld [vmem:[%s1357_s9 + $0x38] sm:$0xff]   ;;  %v462_v25 = vld [vmem:[%s1362_s22 + $0x2] sm:$0x1]  ;;  %v461_v28 = vld [vmem:[%s1362_s22 + $0x1] sm:$0x1]  ;;  %v466_v29 = vrot.slane %v460_v24, %v465_v26  ;;  %p1006_p1 = pnand %p1005_p0, %p1490_p13  ;;  %s1010_s17 = scalar_lea.vmem %s1009_s15, 256 }
  0xa2   : > { %761 = vmatpush3.bf16.msra.mxu0 %v872_v3  ;;  %781 = vmatpush3.bf16.msra.mxu1 %v873_v4  ;;  %v885_v19 = vld [vmem:[%s1350_s2 + $0x38] sm:$0xff]   ;;  %v556_v27 = vmul.f32 %v462_v25, %v460_v24  ;;  %p1011_p3 = scmp.lt.s32.totalorder %s1398_s23, %s1009_s15  ;;  %p1012_p7 = scmp.lt.s32.totalorder %s1010_s17, %s1004_s11 }
  0xa3   : > { %762 = vmatprep.subr.bf16.mxu0 %v1087_v0  ;;  %782 = vmatprep.subr.bf16.mxu1 %v1087_v0  ;;  %v355_v20 = vpack.c.bf16 %v337_v17, %v337_v17  ;;  %p1007_p4 = pneg %p1006_p1 }
  0xa4   : > { %v557_v30 = vadd.f32 %v556_v27, %v461_v28  ;;  %p1013_p2 = por %p1012_p7, %p1011_p3 }
  0xa6   : > { %763 = vmatpush3.bf16.msra.mxu0 %v874_v5  ;;  %783 = vmatpush3.bf16.msra.mxu1 %v875_v6  ;;  %v561_v34 = vrot.slane %v557_v30, %v465_v26  ;;  %p1014_p6 = pnand %p1013_p2, %p1007_p4 }
  0xa7   : > { %764 = vmatprep.subr.bf16.mxu0 %v1087_v0  ;;  %784 = vmatprep.subr.bf16.mxu1 %v1087_v0 }
  0xaa   : > { %765 = vmatpush3.bf16.msra.mxu0 %v876_v7  ;;  %785 = vmatpush3.bf16.msra.mxu1 %v877_v8 }
  0xab   : > { %766 = vmatprep.subr.bf16.mxu0 %v1087_v0  ;;  %786 = vmatprep.subr.bf16.mxu1 %v1087_v0 }
  0xae   : > { %767 = vmatpush3.bf16.msra.mxu0 %v878_v9  ;;  %787 = vmatpush3.bf16.msra.mxu1 %v879_v10 }
  0xaf   : > { %768 = vmatprep.subr.bf16.mxu0 %v1087_v0  ;;  %788 = vmatprep.subr.bf16.mxu1 %v1087_v0 }
  0xb2   : > { %769 = vmatpush3.bf16.msra.mxu0 %v880_v11  ;;  %789 = vmatpush3.bf16.msra.mxu1 %v881_v12 }
  0xb3   : > { %770 = vmatprep.subr.bf16.mxu0 %v1087_v0  ;;  %790 = vmatprep.subr.bf16.mxu1 %v1087_v0 }
  0xb6   : > { %771 = vmatpush3.bf16.msra.mxu0 %v882_v13  ;;  %791 = vmatpush3.bf16.msra.mxu1 %v883_v16 }
  0xb7   : > { %772 = vmatprep.subr.bf16.mxu0 %v1087_v0  ;;  %792 = vmatprep.subr.bf16.mxu1 %v1087_v0 }
  0xba   : > { %773 = vmatpush3.bf16.msra.mxu0 %v884_v18  ;;  %793 = vmatpush3.bf16.msra.mxu1 %v885_v19 }
  0xbd   : > { %775 = vmatmul.mubr.bf16.vlgmr.msra.gmra.mrb[0].mxu0 %v355_v20  ;;  %795 = vmatmul.mubr.bf16.vlgmr.msra.gmra.mrb[0].mxu1 %v338_v21 }
 0x190   : > { %v454_v31 = vpop.f32.mrb[0].mxu0  ;;  %v550_v33 = vpop.f32.mrb[0].mxu1 }
 0x191   : > { %v467_v32 = vmul.f32 %v466_v29, %v454_v31  ;;  %v776_v35 = vpop.f32.mrb[1].mxu0  ;;  %v796_v36 = vpop.f32.mrb[1].mxu1 }
 0x192   : > { %v457_v37 = vpop.f32.mrb[2].mxu0  ;;  %v553_v39 = vpop.f32.mrb[2].mxu1 }
 0x193   : > { %v551_v38 = vadd.f32 %v550_v33, %v467_v32  ;;  %v777_v40 = vpop.f32.mrb[3].mxu0  ;;  %v797_v41 = vpop.f32.mrb[3].mxu1 }
 0x195   : > { %v562_v42 = vadd.f32 %v561_v34, %v551_v38 }
 0x197   : > { %563 = vst [vmem:[%s327_s14] sm:$0xff] %v562_v42 }
 0x198   : > { %1017 = shalt.err (!%p1014_p6)
}
 0x199   : > { %s1018_s24 = scalar_lea.hbm %s1396_s30, 128  ;;  %s1022_s16 = scalar_lea.hbm %s1445_s5, 256 }
 0x19a   : > { %p1019_p11 = scmp.ne.s32.totalorder %s1396_s30, %s1018_s24  ;;  %p1023_p9 = scmp.lt.u32.totalorder %s1396_s30, %s1445_s5 }
 0x19b   : > { %p1024_p5 = scmp.lt.u32.totalorder %s1022_s16, %s1018_s24  ;;  %p1026_p0 = scmp.lt.u32.totalorder %s1018_s24, %s1396_s30 }
 0x19c   : > { %p1020_p12 = pnand %p1019_p11, %p1490_p13 }
 0x19d   : > { %p1025_p10 = por %p1024_p5, %p1023_p9 }
 0x19e   : > { %p1021_p8 = pneg %p1020_p12 }
 0x19f   : > { %p1027_p1 = por %p1026_p0, %p1025_p10 }
 0x1a1   : > { %p1028_p4 = pnand %p1027_p1, %p1021_p8 }
 0x1a3   : > { %1031 = shalt.err (!%p1028_p4)
}
 0x1a4   : > { %808 = dma.vmem_to_hbm [thread:$0]  (%p1490_p13), %s1398_s23, 128, %s1396_s30, %s565_s26  }
 0x1a5 PF: > { %s1491_s20 = sld [smem:[#allocation18_spill]]  ;;  %s590_s9 = sand.u32 1, %s1066_s18  }
 0x1a6   : > { %p1493_p7 = scmp.ge.s32.totalorder %s1078_s21, 2  ;;  %s591_s1 = scalar_lea.sflag [#allocation4], %s590_s9 }
 0x1ab   : > { %p1492_p3 = scmp.ne.s32.totalorder %s1491_s20, 0 }
 0x1ad   : > { %p825_p2 = pnand %p1493_p7, %p1492_p3 }
 0x1af   : > { %1061 = dma.done.wait (!%p825_p2), %s591_s1, 128  }
 0x1b0   : > { %1063 = vsyncadd (!%p825_p2), %s591_s1, 4294967168  ;;  %s1494_s21 = sld [smem:[#allocation16_spill]]  ;;  %s1495_s22 = sld [smem:[#allocation15_spill]] }
 0x1b1   : > { %s1496_s20 = sld [smem:[#allocation17_spill]]  ;;  %s1497_s18 = smov %s1070_s19 }
 0x1b6   : > { %p22_p6 = scmp.ge.s32.totalorder %s1494_s21, 4   ;;  %s1498_s19 = smov %s1495_s22 }
 0x1b8   :  { %24 = sbr.rel (!%p22_p6) target bundleno = 11 (0xb), region = 114 }
 0x1bf   :  { %596 = vsyncpa [#allocation3], 1 }
 0x1c0   :  { %598 = vsyncpa [#allocation3 + $0x1], 1 }
 0x1c1   :  { %599 = vsyncpa [#allocation6], 1 }
 0x1c2   :  { %601 = vsyncpa [#allocation6 + $0x1], 1 }
 0x1c3   :  { %602 = vsyncpa [#allocation9], 1 }
 0x1c4   :  { %604 = vsyncpa [#allocation9 + $0x1], 1 }
 0x1c5   :  { %605 = vsyncpa [#allocation4], 1 }
 0x1c6   :  { %607 = vsyncpa [#allocation4 + $0x1], 1 }

</bundles_post_ra>
